<compile_context>
chip_gen: v7x
topology: tpu7x:2x2x1
jax: 0.10.0
libtpu: 0.0.40
codegen_flags: <defaults>
</compile_context>

<pallas_src>
import jax
import jax.numpy as jnp
from jax.experimental import pallas as pl
from jax.experimental.pallas import tpu as pltpu

LN_EPS = 1e-5


def _fused_sublayer_connection_kernel(x_ref, w_ref, bl_ref, g_ref, b_ref, o_ref):
    # x tile: (tm, H) in the input dtype (f32 here).
    x = x_ref[...]

    # Sublayer Linear on the MXU: bf16 operands, f32 accumulation.
    y = jnp.dot(x.astype(jnp.bfloat16), w_ref[...],
                preferred_element_type=jnp.float32)
    y = y + bl_ref[...].astype(jnp.float32)            # (1, H) broadcast

    # Residual add (dropout == identity in eval mode); LN math in f32.
    z = x.astype(jnp.float32) + y

    # LayerNorm over the lane (H) dim. Two *independent* lane reductions so
    # both XLU reduces can issue back-to-back (no center-then-reduce chain).
    inv_h = jnp.float32(1.0) / jnp.float32(z.shape[-1])
    s1 = jnp.sum(z, axis=-1, keepdims=True)
    s2 = jnp.sum(z * z, axis=-1, keepdims=True)
    mean = s1 * inv_h
    var = jnp.maximum(s2 * inv_h - mean * mean, 0.0)    # guard tiny cancellation
    inv_std = jax.lax.rsqrt(var + LN_EPS)

    gamma = g_ref[...].astype(jnp.float32)              # (1, H) broadcast
    beta = b_ref[...].astype(jnp.float32)
    o_ref[...] = ((z - mean) * inv_std * gamma + beta).astype(o_ref.dtype)


def _round_up(n, m):
    return ((n + m - 1) // m) * m


_SUBLANE_BY_ITEMSIZE = {4: 8, 2: 16, 1: 32}


def sublayer_connection(x, w, b_lin, gamma, beta, *, tm=512):
    """out = LayerNorm(x + (x @ w + b_lin)) with affine (gamma, beta).

    x: (B, S, H); w: (H, H); b_lin / gamma / beta: (H,).
    `tm` = rows per tile (clamped to the row count, rounded to the sublane tile).
    """
    B, S, H = x.shape
    R = B * S
    x2 = x.reshape(R, H)

    # Row tile: round to the input dtype's min sublane tile; 512-row default
    # amortizes the ~0.35us per-grid-step overhead (drop toward 256 on v7x if
    # the VMEM budget below gets tight at large H).
    sublane = _SUBLANE_BY_ITEMSIZE[jnp.dtype(x.dtype).itemsize]
    tm = max(sublane, min(tm, _round_up(R, sublane)))
    tm = _round_up(tm, sublane)

    # Weight as bf16: native MXU dtype on all generations, half the HBM/VMEM.
    w_bf = w.astype(jnp.bfloat16)
    bl2 = b_lin.reshape(1, H).astype(jnp.float32)
    g2 = gamma.reshape(1, H).astype(jnp.float32)
    bt2 = beta.reshape(1, H).astype(jnp.float32)

    # No host-side padding: cdiv grid, Pallas masks the ragged last block.
    grid = (pl.cdiv(R, tm),)

    itemsize = jnp.dtype(x.dtype).itemsize
    # Explicit VMEM budget: double-buffered x/out tiles + single-buffered
    # bf16 W and f32 vectors, plus slack for compiler-internal scratch.
    vmem_bytes = (2 * tm * H * itemsize      # x tiles (double buffered)
                  + 2 * tm * H * itemsize    # out tiles (double buffered)
                  + H * H * 2                # bf16 W (single buffered)
                  + 3 * H * 4)               # b_lin, gamma, beta
    vmem_limit = int(min(vmem_bytes * 1.25 + (4 << 20), 100 << 20))

    cost = pl.CostEstimate(
        flops=2 * R * H * H + 10 * R * H,
        transcendentals=0,
        bytes_accessed=2 * R * H * itemsize + H * H * 2 + 3 * H * 4,
    )

    # Grid-invariant operands: constant index_map => DMA'd once; Buffered(1)
    # stops the default double-buffer from allocating a second VMEM copy.
    resident = dict(pipeline_mode=pl.Buffered(1))

    out2 = pl.pallas_call(
        _fused_sublayer_connection_kernel,
        out_shape=jax.ShapeDtypeStruct((R, H), x.dtype),
        grid=grid,
        in_specs=[
            pl.BlockSpec((tm, H), lambda i: (i, 0)),             # x row tile
            pl.BlockSpec((H, H), lambda i: (0, 0), **resident),  # W (bf16)
            pl.BlockSpec((1, H), lambda i: (0, 0), **resident),  # linear bias
            pl.BlockSpec((1, H), lambda i: (0, 0), **resident),  # LN gamma
            pl.BlockSpec((1, H), lambda i: (0, 0), **resident),  # LN beta
        ],
        out_specs=pl.BlockSpec((tm, H), lambda i: (i, 0)),
        compiler_params=pltpu.CompilerParams(
            # Rows are fully independent -> shard grid across TCs on v7x.
            dimension_semantics=("parallel",),
            vmem_limit_bytes=vmem_limit,
        ),
        cost_estimate=cost,
    )(x2, w_bf, bl2, g2, bt2)

    # TODO(synk): when this layer is stacked and x is dead afterwards, pass
    #             input_output_aliases={0: 0} to reuse x's HBM buffer.
    return out2.reshape(B, S, H)


def _reference(x, w, b_lin, gamma, beta):
    y = jnp.einsum("bsh,hk->bsk", x, w) + b_lin
    z = x + y
    mean = jnp.mean(z, axis=-1, keepdims=True)
    var = jnp.mean((z - mean) ** 2, axis=-1, keepdims=True)
    return (z - mean) / jnp.sqrt(var + LN_EPS) * gamma + beta


if __name__ == "__main__":
    def _make_case(B, S, H, k):
        kx, kw, kb = jax.random.split(k, 3)
        x = jax.random.normal(kx, (B, S, H), dtype=jnp.float32)
        w = jax.random.normal(kw, (H, H), dtype=jnp.float32) * 0.05
        b = jax.random.normal(kb, (H,), dtype=jnp.float32) * 0.05
        gamma = jnp.ones((H,), jnp.float32) + 0.01 * jnp.arange(H, dtype=jnp.float32)
        beta = 0.01 * jnp.arange(H, dtype=jnp.float32)
        return x, w, b, gamma, beta

    # bf16 MXU matmul -> tolerance loosened vs. the f32 reference (LN stays f32).
    ATOL = RTOL = 2e-2

    # Case 1: demo shape (B=2, S=8, H=32); default tm clamps to 16 -> 1 grid step.
    x, w, b, gamma, beta = _make_case(2, 8, 32, jax.random.PRNGKey(0))
    out = sublayer_connection(x, w, b, gamma, beta)
    out = jax.block_until_ready(out)
    ref = _reference(x, w, b, gamma, beta)
    assert out.shape == x.shape
    assert jnp.allclose(out, ref, atol=ATOL, rtol=RTOL), "mismatch (case 1)"

    # Case 2: ragged row count (B=3, S=5 -> 15 rows), tm=8 -> 2 grid steps with a
    # masked ragged last block (no host-side padding).
    x2, w2, b2, g2, bt2 = _make_case(3, 5, 32, jax.random.PRNGKey(1))
    out2 = sublayer_connection(x2, w2, b2, g2, bt2, tm=8)
    out2 = jax.block_until_ready(out2)
    ref2 = _reference(x2, w2, b2, g2, bt2)
    assert out2.shape == x2.shape
    assert jnp.allclose(out2, ref2, atol=ATOL, rtol=RTOL), "mismatch (case 2)"

    print("KERNEL_OK")
</pallas_src>

<mosaic_0001>
module attributes {stable_mosaic.version = 11 : i64} {
  func.func @_fused_sublayer_connection_kernel(%arg0: i32, %arg1: memref<16x32xf32, #tpu.memory_space<vmem>>, %arg2: memref<32x32xbf16, #tpu.memory_space<vmem>>, %arg3: memref<1x32xf32, #tpu.memory_space<vmem>>, %arg4: memref<1x32xf32, #tpu.memory_space<vmem>>, %arg5: memref<1x32xf32, #tpu.memory_space<vmem>>, %arg6: memref<16x32xf32, #tpu.memory_space<vmem>>) attributes {dimension_semantics = [#tpu.dimension_semantics<parallel>], iteration_bounds = array<i64: 1>, scalar_prefetch = 0 : i64, scratch_operands = 0 : i64, tpu.core_type = #tpu.core_type<tc>, window_params = [{transform_indices = @transform_0, window_bounds = array<i64: 16, 32>}, {pipeline_mode = #tpu.pipeline_mode<synchronous>, transform_indices = @transform_1, window_bounds = array<i64: 32, 32>}, {pipeline_mode = #tpu.pipeline_mode<synchronous>, transform_indices = @transform_2, window_bounds = array<i64: 1, 32>}, {pipeline_mode = #tpu.pipeline_mode<synchronous>, transform_indices = @transform_3, window_bounds = array<i64: 1, 32>}, {pipeline_mode = #tpu.pipeline_mode<synchronous>, transform_indices = @transform_4, window_bounds = array<i64: 1, 32>}, {transform_indices = @transform_5, window_bounds = array<i64: 16, 32>}]} {
    %c0 = arith.constant 0 : index
    %c0_0 = arith.constant 0 : index
    %0 = vector.load %arg1[%c0, %c0_0] : memref<16x32xf32, #tpu.memory_space<vmem>>, vector<16x32xf32>
    %1 = arith.truncf %0 : vector<16x32xf32> to vector<16x32xbf16>
    %c0_1 = arith.constant 0 : index
    %c0_2 = arith.constant 0 : index
    %2 = vector.load %arg2[%c0_1, %c0_2] : memref<32x32xbf16, #tpu.memory_space<vmem>>, vector<32x32xbf16>
    %cst = arith.constant dense<0.000000e+00> : vector<16x32xf32>
    %3 = tpu.matmul %1, %2, %cst {dimension_numbers = #tpu.dot_dimension_numbers<[1], [0], [0], [1], [0, 0, 1, 1], [], []>} : vector<16x32xbf16>, vector<32x32xbf16>, vector<16x32xf32> -> vector<16x32xf32>
    %c0_3 = arith.constant 0 : index
    %c0_4 = arith.constant 0 : index
    %4 = vector.load %arg3[%c0_3, %c0_4] : memref<1x32xf32, #tpu.memory_space<vmem>>, vector<1x32xf32>
    %5 = vector.broadcast %4 : vector<1x32xf32> to vector<16x32xf32>
    %6 = arith.addf %3, %5 : vector<16x32xf32>
    %7 = arith.addf %0, %6 : vector<16x32xf32>
    %cst_5 = arith.constant 1.000000e+00 : f32
    %cst_6 = arith.constant 3.200000e+01 : f32
    %8 = arith.divf %cst_5, %cst_6 : f32
    %cst_7 = arith.constant dense<0.000000e+00> : vector<16xf32>
    %9 = vector.multi_reduction <add>, %7, %cst_7 [1] : vector<16x32xf32> to vector<16xf32>
    %10 = vector.shape_cast %9 : vector<16xf32> to vector<16x1xf32>
    %11 = arith.mulf %7, %7 : vector<16x32xf32>
    %cst_8 = arith.constant dense<0.000000e+00> : vector<16xf32>
    %12 = vector.multi_reduction <add>, %11, %cst_8 [1] : vector<16x32xf32> to vector<16xf32>
    %13 = vector.shape_cast %12 : vector<16xf32> to vector<16x1xf32>
    %14 = vector.broadcast %8 : f32 to vector<16x1xf32>
    %15 = arith.mulf %10, %14 : vector<16x1xf32>
    %16 = vector.broadcast %8 : f32 to vector<16x1xf32>
    %17 = arith.mulf %13, %16 : vector<16x1xf32>
    %18 = arith.mulf %15, %15 : vector<16x1xf32>
    %19 = arith.subf %17, %18 : vector<16x1xf32>
    %cst_9 = arith.constant 0.000000e+00 : f32
    %20 = vector.broadcast %cst_9 : f32 to vector<16x1xf32>
    %21 = arith.maximumf %19, %20 : vector<16x1xf32>
    %cst_10 = arith.constant 9.99999974E-6 : f32
    %22 = vector.broadcast %cst_10 : f32 to vector<16x1xf32>
    %23 = arith.addf %21, %22 : vector<16x1xf32>
    %24 = math.rsqrt %23 : vector<16x1xf32>
    %c0_11 = arith.constant 0 : index
    %c0_12 = arith.constant 0 : index
    %25 = vector.load %arg4[%c0_11, %c0_12] : memref<1x32xf32, #tpu.memory_space<vmem>>, vector<1x32xf32>
    %c0_13 = arith.constant 0 : index
    %c0_14 = arith.constant 0 : index
    %26 = vector.load %arg5[%c0_13, %c0_14] : memref<1x32xf32, #tpu.memory_space<vmem>>, vector<1x32xf32>
    %27 = vector.broadcast %15 : vector<16x1xf32> to vector<16x32xf32>
    %28 = arith.subf %7, %27 : vector<16x32xf32>
    %29 = vector.broadcast %24 : vector<16x1xf32> to vector<16x32xf32>
    %30 = arith.mulf %28, %29 : vector<16x32xf32>
    %31 = vector.broadcast %25 : vector<1x32xf32> to vector<16x32xf32>
    %32 = arith.mulf %30, %31 : vector<16x32xf32>
    %33 = vector.broadcast %26 : vector<1x32xf32> to vector<16x32xf32>
    %34 = arith.addf %32, %33 : vector<16x32xf32>
    %c0_15 = arith.constant 0 : index
    %c0_16 = arith.constant 0 : index
    %35 = vector.load %arg6[%c0_15, %c0_16] : memref<16x32xf32, #tpu.memory_space<vmem>>, vector<16x32xf32>
    tpu.vector_store %arg6[%c0_15, %c0_16], %34 {strides = array<i32>} : memref<16x32xf32, #tpu.memory_space<vmem>>, vector<16x32xf32>,
    return
  }
  func.func @transform_0(%arg0: i32) -> (i32, i32) {
    %c0_i32 = arith.constant 0 : i32
    %c0_i32_0 = arith.constant 0 : i32
    return %arg0, %c0_i32 : i32, i32
  }
  func.func @transform_1(%arg0: i32) -> (i32, i32) {
    %c0_i32 = arith.constant 0 : i32
    %c0_i32_0 = arith.constant 0 : i32
    %c0_i32_1 = arith.constant 0 : i32
    return %c0_i32, %c0_i32_0 : i32, i32
  }
  func.func @transform_2(%arg0: i32) -> (i32, i32) {
    %c0_i32 = arith.constant 0 : i32
    %c0_i32_0 = arith.constant 0 : i32
    %c0_i32_1 = arith.constant 0 : i32
    return %c0_i32, %c0_i32_0 : i32, i32
  }
  func.func @transform_3(%arg0: i32) -> (i32, i32) {
    %c0_i32 = arith.constant 0 : i32
    %c0_i32_0 = arith.constant 0 : i32
    %c0_i32_1 = arith.constant 0 : i32
    return %c0_i32, %c0_i32_0 : i32, i32
  }
  func.func @transform_4(%arg0: i32) -> (i32, i32) {
    %c0_i32 = arith.constant 0 : i32
    %c0_i32_0 = arith.constant 0 : i32
    %c0_i32_1 = arith.constant 0 : i32
    return %c0_i32, %c0_i32_0 : i32, i32
  }
  func.func @transform_5(%arg0: i32) -> (i32, i32) {
    %c0_i32 = arith.constant 0 : i32
    %c0_i32_0 = arith.constant 0 : i32
    return %arg0, %c0_i32 : i32, i32
  }
}

</mosaic_0001>

<bundles_post_ra>
// kernel: tpu_custom_call.1
= control target key start
LH: loop header
LB: loop body
LE: loop exit
PB: predicated region body
PF: predicated region fallthrough
CT: control target
= control target key end

     0   :  { %10 = vsyncpa [#allocation3], 0  ;;  %s394_s0 = inlined_call_operand.hbm [shape: f32[16,32], index: 0, kind: input, shape index: {}]   ;;  %s395_s1 = inlined_call_operand.hbm [shape: bf16[32,32], index: 1, kind: input, shape index: {}]   ;;  %s396_s2 = inlined_call_operand.vmem [shape: f32[1,32], index: 2, kind: input, shape index: {}]   ;;  %s397_s3 = inlined_call_operand.vmem [shape: f32[1,32], index: 3, kind: input, shape index: {}]   ;;  %s398_s4 = inlined_call_operand.vmem [shape: f32[1,32], index: 4, kind: input, shape index: {}]   ;;  %s399_s5 = inlined_call_operand.hbm [shape: f32[16,32], index: 5, kind: output, shape index: {}]  }
   0x1   :  { %11 = vsyncpa [#allocation6], 0 }
   0x2   :  { %12 = vsyncpa [#allocation4], 0  ;;  %s297_s18 = smov [#allocation2]   ;;  %s225_s22 = scalar_lea.hbm %s394_s0, 256 }
   0x3   :  { %s18_s19 = sshll.u32 %s297_s18, 4  ;;  %p226_p0 = scmp.ne.s32.totalorder %s394_s0, %s225_s22  ;;  %s19_s19 = int_to_ptr.vmem [resolvable:$true] %s18_s19 }
   0x4   :  { %p229_p1 = scmp.lt.u32.totalorder %s225_s22, %s394_s0 }
   0x6   :  { %p231_p2 = pnand %p229_p1, %p226_p0 }
   0x8   :  { %234 = shalt.err (!%p231_p2)
}
   0x9   :  { %s235_s27 = scalar_lea.vmem %s19_s19, 256  ;;  %p240_p4 = scmp.lt.s32.totalorder %s19_s19, %s19_s19 }
   0xa   :  { %p236_p3 = scmp.ne.s32.totalorder %s19_s19, %s235_s27  ;;  %p241_p5 = scmp.lt.s32.totalorder %s235_s27, %s235_s27 }
   0xc   :  { %p242_p6 = por %p241_p5, %p240_p4 }
   0xe   :  { %p243_p7 = pnand %p242_p6, %p236_p3 }
  0x10   :  { %246 = shalt.err (!%p243_p7)
}
  0x11   :  { %s298_s28 = smov 128   ;;  %s299_s29 = smov 8  }
  0x12   :  { %24 = dma.hbm_to_vmem [thread:$0]  %s394_s0, 256, %s19_s19, [#allocation3], %s298_s28, %s298_s28, %s299_s29  }
  0x13   :  { %s300_s7 = smov [#allocation5]   ;;  %s247_s11 = scalar_lea.hbm %s395_s1, 256 }
  0x14   :  { %s30_s8 = sshll.u32 %s300_s7, 4  ;;  %p248_p8 = scmp.ne.s32.totalorder %s395_s1, %s247_s11  ;;  %s31_s8 = int_to_ptr.vmem [resolvable:$true] %s30_s8 }
  0x15   :  { %p251_p9 = scmp.lt.u32.totalorder %s247_s11, %s395_s1 }
  0x17   :  { %p253_p10 = pnand %p251_p9, %p248_p8 }
  0x19   :  { %256 = shalt.err (!%p253_p10)
}
  0x1a   :  { %s257_s16 = scalar_lea.vmem %s31_s8, 256  ;;  %p262_p12 = scmp.lt.s32.totalorder %s31_s8, %s31_s8 }
  0x1b   :  { %p258_p11 = scmp.ne.s32.totalorder %s31_s8, %s257_s16  ;;  %p263_p13 = scmp.lt.s32.totalorder %s257_s16, %s257_s16 }
  0x1d   :  { %p264_p0 = por %p263_p13, %p262_p12 }
  0x1f   :  { %p265_p1 = pnand %p264_p0, %p258_p11 }
  0x21   :  { %268 = shalt.err (!%p265_p1)
}
  0x22   :  { %s301_s0 = smov 64   ;;  %s302_s17 = smov 4  }
  0x23   :  { %36 = dma.hbm_to_vmem [thread:$0]  %s395_s1, 256, %s31_s8, [#allocation6], %s301_s0, %s301_s0, %s302_s17  }
  0x24   :  { %291 = dma.done.wait [#allocation3], 256  }
  0x25   :  { %292 = vsyncadd [#allocation3], 4294967040 }
  0x26   :  { %293 = dma.done.wait [#allocation6], 256  }
  0x27   :  { %294 = vsyncadd [#allocation6], 4294967040  ;;  %v303_v0 = vmov 0.0   ;;  %vm304_vm0 = vmmov 0   ;;  %v219_v1 = vld [vmem:[#allocation5] sm:$0xff]   ;;  %v220_v2 = vld [vmem:[#allocation5 + $0x8] sm:$0xff]  }
  0x28   :  { %202 = vmatprep.subr.bf16.mxu0 %v303_v0  ;;  %206 = vmatprep.mubr.msk.bf16.mxu0 %vm304_vm0, %v303_v0  ;;  %v50_v3 = vld [vmem:[#allocation2] sm:$0xff]  ;;  %v51_v4 = vld [vmem:[#allocation2 + $0x8] sm:$0xff]  ;;  %vm76_vm1 = vcmask 261120   ;;  %s305_s24 = smov [#allocation7]  }
  0x29   :  { %203 = vmatpush3.bf16.msra.mxu0 %v219_v1  ;;  %v52_v5 = vpack.c.bf16 %v51_v4, %v50_v3  ;;  %v193_v6 = vld [vmem:[%s396_s2] ss:$0 sm:$0xff]  ;;  %s180_s25 = sshll.u32 %s305_s24, 4  ;;  %s181_s25 = int_to_ptr.vmem [resolvable:$true] %s180_s25 }
  0x2a   :  { %204 = vmatprep.subr.bf16.mxu0 %v303_v0  ;;  %v197_v39 = vld [vmem:[%s397_s3] ss:$0 sm:$0xff]  ;;  %s269_s3 = scalar_lea.vmem %s181_s25, 256  ;;  %p274_p3 = scmp.lt.s32.totalorder %s181_s25, %s181_s25 }
  0x2b   :  { %v198_v41 = vld [vmem:[%s398_s4] ss:$0 sm:$0xff]  ;;  %p270_p2 = scmp.ne.s32.totalorder %s181_s25, %s269_s3  ;;  %p275_p4 = scmp.lt.s32.totalorder %s269_s3, %s269_s3 }
  0x2d   :  { %205 = vmatpush3.bf16.msra.mxu0 %v220_v2  ;;  %p276_p5 = por %p275_p4, %p274_p3 }
  0x2f   :  { %p277_p6 = pnand %p276_p5, %p270_p2 }
  0x30   :  { %207 = vmatmul.mubr.msk.bf16.vlgmr.msra.gmra.mrb[0].mxu0 %vm76_vm1, %v52_v5 }
 0x103   :  { %v114_v7 = vpop.f32.mrb[0].mxu0 }
 0x104   :  { %v115_v8 = vadd.f32 %v193_v6, %v114_v7  ;;  %v208_v9 = vpop.f32.mrb[1].mxu0 }
 0x105   :  { %v117_v10 = vpop.f32.mrb[2].mxu0 }
 0x106   :  { %v121_v11 = vadd.f32 %v115_v8, %v50_v3  ;;  %v118_v12 = vadd.f32 %v193_v6, %v117_v10  ;;  %v209_v13 = vpop.f32.mrb[3].mxu0 }
 0x108   :  { %v122_v14 = vadd.f32 %v118_v12, %v51_v4  ;;  %v123_v15 = vsel %vm76_vm1, %v121_v11, 0.0  ;;  %v129_v16 = vmul.f32 %v121_v11, %v121_v11 }
 0x109   :  { %124 = vadd.xlane.f32.xlu0 %v123_v15 }
 0x10a   :  { %v131_v17 = vsel %vm76_vm1, %v129_v16, 0.0  ;;  %v130_v18 = vmul.f32 %v122_v14, %v122_v14  ;;  %v126_v19 = vsel %vm76_vm1, %v122_v14, 0.0 }
 0x10b   :  { %132 = vadd.xlane.f32.xlu1 %v131_v17 }
 0x10c   :  { %v134_v20 = vsel %vm76_vm1, %v130_v18, 0.0 }
 0x10d   :  { %127 = vadd.xlane.f32.xlu0 %v126_v19 }
 0x10f   :  { %135 = vadd.xlane.f32.xlu1 %v134_v20 }
 0x196   :  { %v125_v21 = vpop.xlane.xlu0 %124 }
 0x197   :  { %v137_v22 = vmul.f32 0.03125, %v125_v21 }
 0x198   :  { %v133_v23 = vpop.xlane.xlu1 %132 }
 0x199   :  { %v141_v24 = vmul.f32 %v137_v22, %v137_v22  ;;  %v139_v25 = vmul.f32 0.03125, %v133_v23  ;;  %v153_v37 = vsub.f32 %v121_v11, %v137_v22 }
 0x19a   :  { %v128_v26 = vpop.xlane.xlu0 %127 }
 0x19b   :  { %v143_v27 = vsub.f32 %v139_v25, %v141_v24  ;;  %v138_v28 = vmul.f32 0.03125, %v128_v26 }
 0x19c   :  { %v136_v29 = vpop.xlane.xlu1 %135 }
 0x19d   :  { %v145_v30 = vmax.f32 %v143_v27, 0.0  ;;  %v142_v31 = vmul.f32 %v138_v28, %v138_v28  ;;  %v140_v32 = vmul.f32 0.03125, %v136_v29  ;;  %v154_v42 = vsub.f32 %v122_v14, %v138_v28 }
 0x19f   :  { %v147_v33 = vadd.f32 1e-05, %v145_v30  ;;  %v144_v34 = vsub.f32 %v140_v32, %v142_v31 }
 0x1a1   :  { %221 = vrsqrt.f32 %v147_v33  ;;  %v146_v35 = vmax.f32 %v144_v34, 0.0 }
 0x1a3   :  { %v148_v36 = vadd.f32 1e-05, %v146_v35 }
 0x1a5   :  { %223 = vrsqrt.f32 %v148_v36 }
 0x1ab   :  { %v222_v38 = vpop.eup %221 }
 0x1ac   :  { %v155_v40 = vmul.f32 %v222_v38, %v153_v37 }
 0x1ae   :  { %v163_v43 = vmul.f32 %v197_v39, %v155_v40 }
 0x1af   :  { %v224_v44 = vpop.eup %223 }
 0x1b0   :  { %v156_v45 = vmul.f32 %v224_v44, %v154_v42  ;;  %v171_v46 = vadd.f32 %v198_v41, %v163_v43 }
 0x1b2   :  { %v164_v47 = vmul.f32 %v197_v39, %v156_v45  ;;  %173 = vst.msk [vmem:[#allocation7] sm:$0xff] %vm76_vm1, %v171_v46 }
 0x1b4   :  { %v172_v48 = vadd.f32 %v198_v41, %v164_v47 }
 0x1b6   :  { %174 = vst.msk [vmem:[#allocation7 + $0x8] sm:$0xff] %vm76_vm1, %v172_v48 }
 0x1b7   :  { %280 = shalt.err (!%p277_p6)
}
 0x1b8   :  { %s281_s27 = scalar_lea.hbm %s399_s5, 256 }
 0x1b9   :  { %p282_p7 = scmp.ne.s32.totalorder %s399_s5, %s281_s27  ;;  %p285_p8 = scmp.lt.u32.totalorder %s281_s27, %s399_s5 }
 0x1bb   :  { %p287_p9 = pnand %p285_p8, %p282_p7 }
 0x1bd   :  { %290 = shalt.err (!%p287_p9)
}
 0x1be   :  { %186 = dma.vmem_to_hbm [thread:$0]  %s181_s25, 256, %s399_s5, [#allocation4], %s298_s28, %s298_s28, %s299_s29  }
 0x1bf   :  { %295 = dma.done.wait [#allocation4], 256  }
 0x1c0   :  { %296 = vsyncadd [#allocation4], 4294967040 }
 0x1c1   :  { %190 = vsyncpa [#allocation3], 1 }
 0x1c2   :  { %191 = vsyncpa [#allocation6], 1 }
 0x1c3   :  { %192 = vsyncpa [#allocation4], 1 }

</bundles_post_ra>
